<compile_context>
chip_gen: v5e
topology: v5e:2x2
jax: 0.10.0
libtpu: 0.0.40
codegen_flags: <defaults>
</compile_context>

<pallas_src>
import functools

import jax
import jax.numpy as jnp
from jax.experimental import pallas as pl
from jax.experimental.pallas import tpu as pltpu

STAB_NB = 1e-12    # f32-appropriate clamp (reference uses 1e-15 in float64)
RANGE_EPS = 1e-12  # guards x_max == x_min in normalize_prob


def _surf_nsb_kernel(x_ref, v_ref, w_ref, mu_ref, *, training, col_scale,
                     use_mxu_conv):
    """One (1, C, H, Wt) x-tile -> one (1, 1, Wt) mu-tile.

    x_ref : (1, C, H, Wt) VMEM  NCHW tile (W on lanes, H on sublanes)
    v_ref : (8, H)        VMEM  Vandermonde of normalized column indices,
                                rows [1, x, x^2, x^3, x^4, 0, 0, 0]
    w_ref : (C,) SMEM  or (8, C) VMEM  unary 1x1-conv weights
    mu_ref: (1, 1, Wt)    VMEM
    """
    _, C, H, Wt = x_ref.shape

    # ---- unary head: 1x1 conv (C -> 1); bias dropped (shift-invariant) -----
    if use_mxu_conv:
        # Channel contraction on the MXU (only taken for C >= 8).
        x2d = x_ref[0].reshape(C, H * Wt)
        logits = jnp.dot(w_ref[...], x2d,
                         preferred_element_type=jnp.float32)[0:1, :]
        logits = logits.reshape(H, Wt)
    else:
        logits = w_ref[0] * x_ref[0, 0]
        for c in range(1, C):                  # C small & static -> unrolled
            logits = logits + w_ref[c] * x_ref[0, c]

    # ---- normalize_prob: min-max normalize along H (axis 0), add 0.001 -----
    x_min = jnp.min(logits, axis=0, keepdims=True)
    x_max = jnp.max(logits, axis=0, keepdims=True)
    rng = jnp.maximum(x_max - x_min, jnp.float32(RANGE_EPS))
    y = (logits - x_min) / rng + 0.001         # exact divide: (1, Wt) data

    # ---- gaus_fit: weighted Gaussian regression along H ---------------------
    lny = jnp.log(y)
    y2 = y * y
    y2lny = y2 * lny

    vmat = v_ref[...]                          # (8, H), rows 5..7 are zeros
    m = jnp.dot(vmat, y2, preferred_element_type=jnp.float32)       # (8, Wt)
    mln = jnp.dot(vmat, y2lny, preferred_element_type=jnp.float32)  # (8, Wt)

    s_y2 = m[0:1, :]
    s_xy2 = m[1:2, :]
    s_x2y2 = m[2:3, :]
    s_x3y2 = m[3:4, :]
    s_x4y2 = m[4:5, :]
    s_y2lny = mln[0:1, :]
    s_xy2lny = mln[1:2, :]
    s_x2y2lny = mln[2:3, :]

    b_num = (s_x2y2 * s_x2y2 * s_xy2lny
             - s_y2 * s_x4y2 * s_xy2lny
             + s_xy2 * s_x4y2 * s_y2lny
             + s_y2 * s_x3y2 * s_x2y2lny
             - s_x2y2 * s_x3y2 * s_y2lny
             - s_xy2 * s_x2y2 * s_x2y2lny)

    c_num = (s_x2y2lny * s_xy2 * s_xy2
             - s_xy2lny * s_xy2 * s_x2y2
             - s_x3y2 * s_y2lny * s_xy2
             + s_y2lny * s_x2y2 * s_x2y2
             - s_y2 * s_x2y2lny * s_x2y2
             + s_y2 * s_x3y2 * s_xy2lny)

    stab = jnp.float32(STAB_NB)
    c_safe = jnp.where(jnp.abs(c_num) < stab,
                       jnp.where(c_num >= 0.0, stab, -stab),   # sign(0) -> +stab
                       c_num)

    # Exact divide (tiny (1, Wt) data; accuracy is free here).
    mu = (-0.5 * col_scale) * (b_num / c_safe)

    if not training:                           # static tr_flag=False branch
        mu = jnp.clip(mu, 0.0, col_scale)      # col_scale == H - 1

    mu_ref[0] = mu.astype(jnp.float32)


def _vmem_budget_bytes():
    """Generation-aware VMEM budget (~3/4 of physical, leaves Mosaic headroom):
    ~96 MiB on v5e/v6e (128 MiB VMEM), ~48 MiB on v7x (64 MiB VMEM)."""
    try:
        cap = int(pltpu.get_tpu_info().vmem_capacity_bytes)
    except Exception:
        cap = 64 * 1024 * 1024                 # conservative (v7x-sized) fallback
    return (cap * 3) // 4


def _pick_tile_w(w_pad, c, h, budget):
    """Largest lane tile (multiple of 128 dividing w_pad) whose double-buffered
    x tile plus live (H, Wt) f32 temporaries fit the VMEM budget."""
    cands = [k * 128 for k in range(w_pad // 128, 0, -1)
             if w_pad % (k * 128) == 0]

    def footprint(wt):
        x_tile = c * h * wt * 4                # one x block
        temps = 8 * h * wt * 4                 # logits/y/lny/y2/y2lny + slack
        out = wt * 4
        vmem_misc = 2 * 8 * h * 4
        return 2 * x_tile + 2 * out + temps + vmem_misc

    for wt in cands:
        if footprint(wt) <= budget:
            return wt
    return 128


def surf_seg_nsb_forward(x, conv_weight, conv_bias=None, *, training=True):
    """SurfSegNSBNet.forward: x (B, C, H, W) NCHW float32 -> mu (B, W).

    conv_bias is accepted for interface parity with the (synthetic) unary 1x1
    conv, but the head has a single output channel and min-max normalization
    is shift-invariant, so the bias cannot affect the output and is dropped."""
    del conv_bias
    B, C, H, W = x.shape
    x = x.astype(jnp.float32)
    conv_weight = conv_weight.astype(jnp.float32)

    # Lane-dense W: pad up to a multiple of 128; padded lanes are sliced off
    # afterwards (no cross-W coupling in the kernel, so padding is inert).
    W_pad = ((W + 127) // 128) * 128
    if W_pad != W:
        x = jnp.pad(x, ((0, 0), (0, 0), (0, 0), (0, W_pad - W)))

    budget = _vmem_budget_bytes()
    wt = _pick_tile_w(W_pad, C, H, budget)

    # Keep >= 2 grid steps along the parallel axes so both TensorCores of a
    # 2-TC chip (v7x) get work; near-free on single-TC chips.
    if B * (W_pad // wt) < 2:
        for k in range(W_pad // 128, 0, -1):
            wt2 = k * 128
            if W_pad % wt2 == 0 and W_pad // wt2 >= 2:
                wt = wt2
                break

    grid = (B, W_pad // wt)
    col_scale = float(max(H - 1, 1))

    # Vandermonde of *normalized* column indices, padded to 8 sublanes so the
    # moment-matmul result tile is sublane-aligned and row extracts are cheap.
    col = jnp.arange(H, dtype=jnp.float32) / jnp.float32(col_scale)
    zero = jnp.zeros_like(col)
    vmat = jnp.stack([jnp.ones_like(col), col, col ** 2, col ** 3, col ** 4,
                      zero, zero, zero], axis=0)                     # (8, H)

    use_mxu_conv = C >= 8
    if use_mxu_conv:
        w_arg = jnp.zeros((8, C), jnp.float32).at[0].set(conv_weight)
        w_spec = pl.BlockSpec((8, C), lambda b, j: (0, 0))
    else:
        w_arg = conv_weight
        w_spec = pl.BlockSpec(memory_space=pltpu.MemorySpace.SMEM)

    kernel = functools.partial(_surf_nsb_kernel, training=training,
                               col_scale=col_scale, use_mxu_conv=use_mxu_conv)

    # Advisory cost model: firmly HBM-bandwidth bound.
    bytes_accessed = B * C * H * W_pad * 4 + B * W_pad * 4 + 8 * H * 4
    flops = B * W_pad * (H * (2 * C + 8) + 4 * 8 * H + 64)
    cost = pl.CostEstimate(flops=flops,
                           transcendentals=B * W_pad * H,
                           bytes_accessed=bytes_accessed)

    out = pl.pallas_call(
        kernel,
        out_shape=jax.ShapeDtypeStruct((B, 1, W_pad), jnp.float32),
        grid=grid,
        in_specs=[
            pl.BlockSpec((1, C, H, wt), lambda b, j: (b, 0, 0, j)),   # x tile
            pl.BlockSpec((8, H), lambda b, j: (0, 0)),                # V (resident)
            w_spec,                                                    # conv weight
        ],
        out_specs=pl.BlockSpec((1, 1, wt), lambda b, j: (b, 0, j)),
        compiler_params=pltpu.CompilerParams(
            dimension_semantics=("parallel", "parallel"),
            vmem_limit_bytes=int(budget)),
        cost_estimate=cost,
    )(x, vmat, w_arg)
    return out[:, 0, :W]


if __name__ == "__main__":
    key = jax.random.PRNGKey(0)
    kx, kw, kb = jax.random.split(key, 3)

    B, C, H, W = 2, 4, 16, 16
    x = jax.random.normal(kx, (B, C, H, W), dtype=jnp.float32)
    # deterministic synthetic unary (1x1 conv) parameters
    conv_weight = 0.1 * jax.random.normal(kw, (C,), dtype=jnp.float32)
    conv_bias = 0.1 * jax.random.normal(kb, (1,), dtype=jnp.float32)

    mean = surf_seg_nsb_forward(x, conv_weight, conv_bias, training=True)
    mean = jax.block_until_ready(mean)

    assert mean.shape == (B, W), mean.shape
    # host-side stand-in for the reference's in-graph NaN check
    assert not bool(jnp.isnan(mean).any()), "mu got NaN value."
    print("KERNEL_OK")
</pallas_src>

<mosaic_0001>
module attributes {stable_mosaic.version = 11 : i64} {
  func.func @_surf_nsb_kernel(%arg0: i32, %arg1: i32, %arg2: memref<1x4x16x128xf32, #tpu.memory_space<vmem>>, %arg3: memref<8x16xf32, #tpu.memory_space<vmem>>, %arg4: memref<4xf32, #tpu.memory_space<smem>>, %arg5: memref<1x1x128xf32, #tpu.memory_space<vmem>>) attributes {dimension_semantics = [#tpu.dimension_semantics<parallel>, #tpu.dimension_semantics<parallel>], iteration_bounds = array<i64: 2, 1>, scalar_prefetch = 0 : i64, scratch_operands = 0 : i64, tpu.core_type = #tpu.core_type<tc>, window_params = [{transform_indices = @transform_0, window_bounds = array<i64: 1, 4, 16, 128>}, {pipeline_mode = #tpu.pipeline_mode<synchronous>, transform_indices = @transform_1, window_bounds = array<i64: 8, 16>}, {transform_indices = @transform_2, window_bounds = array<i64: 4>}, {transform_indices = @transform_3, window_bounds = array<i64: 1, 1, 128>}]} {
    %c0 = arith.constant 0 : index
    %0 = memref.load %arg4[%c0] : memref<4xf32, #tpu.memory_space<smem>>
    %c0_0 = arith.constant 0 : index
    %c0_1 = arith.constant 0 : index
    %c0_2 = arith.constant 0 : index
    %c0_3 = arith.constant 0 : index
    %1 = vector.load %arg2[%c0_0, %c0_1, %c0_2, %c0_3] : memref<1x4x16x128xf32, #tpu.memory_space<vmem>>, vector<1x1x16x128xf32>
    %2 = vector.shape_cast %1 : vector<1x1x16x128xf32> to vector<16x128xf32>
    %3 = vector.broadcast %0 : f32 to vector<16x128xf32>
    %4 = arith.mulf %3, %2 : vector<16x128xf32>
    %c1 = arith.constant 1 : index
    %5 = memref.load %arg4[%c1] : memref<4xf32, #tpu.memory_space<smem>>
    %c0_4 = arith.constant 0 : index
    %c1_5 = arith.constant 1 : index
    %c0_6 = arith.constant 0 : index
    %c0_7 = arith.constant 0 : index
    %6 = vector.load %arg2[%c0_4, %c1_5, %c0_6, %c0_7] : memref<1x4x16x128xf32, #tpu.memory_space<vmem>>, vector<1x1x16x128xf32>
    %7 = vector.shape_cast %6 : vector<1x1x16x128xf32> to vector<16x128xf32>
    %8 = vector.broadcast %5 : f32 to vector<16x128xf32>
    %9 = arith.mulf %8, %7 : vector<16x128xf32>
    %10 = arith.addf %4, %9 : vector<16x128xf32>
    %c2 = arith.constant 2 : index
    %11 = memref.load %arg4[%c2] : memref<4xf32, #tpu.memory_space<smem>>
    %c0_8 = arith.constant 0 : index
    %c2_9 = arith.constant 2 : index
    %c0_10 = arith.constant 0 : index
    %c0_11 = arith.constant 0 : index
    %12 = vector.load %arg2[%c0_8, %c2_9, %c0_10, %c0_11] : memref<1x4x16x128xf32, #tpu.memory_space<vmem>>, vector<1x1x16x128xf32>
    %13 = vector.shape_cast %12 : vector<1x1x16x128xf32> to vector<16x128xf32>
    %14 = vector.broadcast %11 : f32 to vector<16x128xf32>
    %15 = arith.mulf %14, %13 : vector<16x128xf32>
    %16 = arith.addf %10, %15 : vector<16x128xf32>
    %c3 = arith.constant 3 : index
    %17 = memref.load %arg4[%c3] : memref<4xf32, #tpu.memory_space<smem>>
    %c0_12 = arith.constant 0 : index
    %c3_13 = arith.constant 3 : index
    %c0_14 = arith.constant 0 : index
    %c0_15 = arith.constant 0 : index
    %18 = vector.load %arg2[%c0_12, %c3_13, %c0_14, %c0_15] : memref<1x4x16x128xf32, #tpu.memory_space<vmem>>, vector<1x1x16x128xf32>
    %19 = vector.shape_cast %18 : vector<1x1x16x128xf32> to vector<16x128xf32>
    %20 = vector.broadcast %17 : f32 to vector<16x128xf32>
    %21 = arith.mulf %20, %19 : vector<16x128xf32>
    %22 = arith.addf %16, %21 : vector<16x128xf32>
    %cst = arith.constant dense<0x7F800000> : vector<128xf32>
    %23 = vector.multi_reduction <minimumf>, %22, %cst [0] : vector<16x128xf32> to vector<128xf32>
    %24 = vector.shape_cast %23 : vector<128xf32> to vector<1x128xf32>
    %cst_16 = arith.constant dense<0xFF800000> : vector<128xf32>
    %25 = vector.multi_reduction <maximumf>, %22, %cst_16 [0] : vector<16x128xf32> to vector<128xf32>
    %26 = vector.shape_cast %25 : vector<128xf32> to vector<1x128xf32>
    %27 = arith.subf %26, %24 : vector<1x128xf32>
    %cst_17 = arith.constant 9.99999996E-13 : f32
    %28 = vector.broadcast %cst_17 : f32 to vector<1x128xf32>
    %29 = arith.maximumf %27, %28 : vector<1x128xf32>
    %30 = vector.broadcast %24 : vector<1x128xf32> to vector<16x128xf32>
    %31 = arith.subf %22, %30 : vector<16x128xf32>
    %32 = vector.broadcast %29 : vector<1x128xf32> to vector<16x128xf32>
    %33 = arith.divf %31, %32 : vector<16x128xf32>
    %cst_18 = arith.constant 1.000000e-03 : f32
    %34 = vector.broadcast %cst_18 : f32 to vector<16x128xf32>
    %35 = arith.addf %33, %34 : vector<16x128xf32>
    %36 = math.log %35 : vector<16x128xf32>
    %37 = arith.mulf %35, %35 : vector<16x128xf32>
    %38 = arith.mulf %37, %36 : vector<16x128xf32>
    %c0_19 = arith.constant 0 : index
    %c0_20 = arith.constant 0 : index
    %39 = vector.load %arg3[%c0_19, %c0_20] : memref<8x16xf32, #tpu.memory_space<vmem>>, vector<8x16xf32>
    %cst_21 = arith.constant dense<0.000000e+00> : vector<8x128xf32>
    %40 = tpu.matmul %39, %37, %cst_21 {dimension_numbers = #tpu.dot_dimension_numbers<[1], [0], [0], [1], [0, 0, 1, 1], [], []>} : vector<8x16xf32>, vector<16x128xf32>, vector<8x128xf32> -> vector<8x128xf32>
    %cst_22 = arith.constant dense<0.000000e+00> : vector<8x128xf32>
    %41 = tpu.matmul %39, %38, %cst_22 {dimension_numbers = #tpu.dot_dimension_numbers<[1], [0], [0], [1], [0, 0, 1, 1], [], []>} : vector<8x16xf32>, vector<16x128xf32>, vector<8x128xf32> -> vector<8x128xf32>
    %42 = vector.extract_strided_slice %40 {offsets = [0, 0], sizes = [1, 128], strides = [1, 1]} : vector<8x128xf32> to vector<1x128xf32>
    %43 = vector.extract_strided_slice %40 {offsets = [1, 0], sizes = [1, 128], strides = [1, 1]} : vector<8x128xf32> to vector<1x128xf32>
    %44 = vector.extract_strided_slice %40 {offsets = [2, 0], sizes = [1, 128], strides = [1, 1]} : vector<8x128xf32> to vector<1x128xf32>
    %45 = vector.extract_strided_slice %40 {offsets = [3, 0], sizes = [1, 128], strides = [1, 1]} : vector<8x128xf32> to vector<1x128xf32>
    %46 = vector.extract_strided_slice %40 {offsets = [4, 0], sizes = [1, 128], strides = [1, 1]} : vector<8x128xf32> to vector<1x128xf32>
    %47 = vector.extract_strided_slice %41 {offsets = [0, 0], sizes = [1, 128], strides = [1, 1]} : vector<8x128xf32> to vector<1x128xf32>
    %48 = vector.extract_strided_slice %41 {offsets = [1, 0], sizes = [1, 128], strides = [1, 1]} : vector<8x128xf32> to vector<1x128xf32>
    %49 = vector.extract_strided_slice %41 {offsets = [2, 0], sizes = [1, 128], strides = [1, 1]} : vector<8x128xf32> to vector<1x128xf32>
    %50 = arith.mulf %44, %44 : vector<1x128xf32>
    %51 = arith.mulf %50, %48 : vector<1x128xf32>
    %52 = arith.mulf %42, %46 : vector<1x128xf32>
    %53 = arith.mulf %52, %48 : vector<1x128xf32>
    %54 = arith.subf %51, %53 : vector<1x128xf32>
    %55 = arith.mulf %43, %46 : vector<1x128xf32>
    %56 = arith.mulf %55, %47 : vector<1x128xf32>
    %57 = arith.addf %54, %56 : vector<1x128xf32>
    %58 = arith.mulf %42, %45 : vector<1x128xf32>
    %59 = arith.mulf %58, %49 : vector<1x128xf32>
    %60 = arith.addf %57, %59 : vector<1x128xf32>
    %61 = arith.mulf %44, %45 : vector<1x128xf32>
    %62 = arith.mulf %61, %47 : vector<1x128xf32>
    %63 = arith.subf %60, %62 : vector<1x128xf32>
    %64 = arith.mulf %43, %44 : vector<1x128xf32>
    %65 = arith.mulf %64, %49 : vector<1x128xf32>
    %66 = arith.subf %63, %65 : vector<1x128xf32>
    %67 = arith.mulf %49, %43 : vector<1x128xf32>
    %68 = arith.mulf %67, %43 : vector<1x128xf32>
    %69 = arith.mulf %48, %43 : vector<1x128xf32>
    %70 = arith.mulf %69, %44 : vector<1x128xf32>
    %71 = arith.subf %68, %70 : vector<1x128xf32>
    %72 = arith.mulf %45, %47 : vector<1x128xf32>
    %73 = arith.mulf %72, %43 : vector<1x128xf32>
    %74 = arith.subf %71, %73 : vector<1x128xf32>
    %75 = arith.mulf %47, %44 : vector<1x128xf32>
    %76 = arith.mulf %75, %44 : vector<1x128xf32>
    %77 = arith.addf %74, %76 : vector<1x128xf32>
    %78 = arith.mulf %42, %49 : vector<1x128xf32>
    %79 = arith.mulf %78, %44 : vector<1x128xf32>
    %80 = arith.subf %77, %79 : vector<1x128xf32>
    %81 = arith.mulf %42, %45 : vector<1x128xf32>
    %82 = arith.mulf %81, %48 : vector<1x128xf32>
    %83 = arith.addf %80, %82 : vector<1x128xf32>
    %84 = math.absf %83 : vector<1x128xf32>
    %cst_23 = arith.constant 9.99999996E-13 : f32
    %85 = vector.broadcast %cst_23 : f32 to vector<1x128xf32>
    %86 = arith.cmpf olt, %84, %85 : vector<1x128xf32>
    %cst_24 = arith.constant 0.000000e+00 : f32
    %87 = vector.broadcast %cst_24 : f32 to vector<1x128xf32>
    %88 = arith.cmpf oge, %83, %87 : vector<1x128xf32>
    %cst_25 = arith.constant 0.000000e+00 : f32
    %cst_26 = arith.constant 9.99999996E-13 : f32
    %89 = arith.subf %cst_25, %cst_26 : f32
    %cst_27 = arith.constant 9.99999996E-13 : f32
    %90 = vector.broadcast %cst_27 : f32 to vector<1x128xf32>
    %91 = vector.broadcast %89 : f32 to vector<1x128xf32>
    %92 = arith.select %88, %90, %91 : vector<1x128xi1>, vector<1x128xf32>
    %93 = arith.select %86, %92, %83 : vector<1x128xi1>, vector<1x128xf32>
    %94 = arith.divf %66, %93 : vector<1x128xf32>
    %cst_28 = arith.constant -7.500000e+00 : f32
    %95 = vector.broadcast %cst_28 : f32 to vector<1x128xf32>
    %96 = arith.mulf %95, %94 : vector<1x128xf32>
    %c0_29 = arith.constant 0 : index
    %c0_30 = arith.constant 0 : index
    %c0_31 = arith.constant 0 : index
    %97 = vector.load %arg5[%c0_29, %c0_30, %c0_31] : memref<1x1x128xf32, #tpu.memory_space<vmem>>, vector<1x1x128xf32>
    %98 = vector.shape_cast %97 : vector<1x1x128xf32> to vector<1x128xf32>
    %99 = vector.shape_cast %96 : vector<1x128xf32> to vector<1x1x128xf32>
    tpu.vector_store %arg5[%c0_29, %c0_30, %c0_31], %99 {strides = array<i32>} : memref<1x1x128xf32, #tpu.memory_space<vmem>>, vector<1x1x128xf32>,
    return
  }
  func.func @transform_0(%arg0: i32, %arg1: i32) -> (i32, i32, i32, i32) {
    %c0_i32 = arith.constant 0 : i32
    %c0_i32_0 = arith.constant 0 : i32
    %c0_i32_1 = arith.constant 0 : i32
    return %arg0, %c0_i32, %c0_i32_0, %arg1 : i32, i32, i32, i32
  }
  func.func @transform_1(%arg0: i32, %arg1: i32) -> (i32, i32) {
    %c0_i32 = arith.constant 0 : i32
    %c0_i32_0 = arith.constant 0 : i32
    %c0_i32_1 = arith.constant 0 : i32
    return %c0_i32, %c0_i32_0 : i32, i32
  }
  func.func @transform_2(%arg0: i32, %arg1: i32) -> i32 {
    %c0_i32 = arith.constant 0 : i32
    %c0_i32_0 = arith.constant 0 : i32
    return %c0_i32 : i32
  }
  func.func @transform_3(%arg0: i32, %arg1: i32) -> (i32, i32, i32) {
    %c0_i32 = arith.constant 0 : i32
    %c0_i32_0 = arith.constant 0 : i32
    return %arg0, %c0_i32, %arg1 : i32, i32, i32
  }
}

</mosaic_0001>

<bundles_post_ra>
// kernel: tpu_custom_call.1
= control target key start
LH: loop header
LB: loop body
LE: loop exit
PB: predicated region body
PF: predicated region fallthrough
CT: control target
= control target key end

     0   :  { %s1047_s0 = inlined_call_operand.hbm [shape: f32[2,4,16,128], index: 0, kind: input, shape index: {}]   ;;  %s1048_s1 = inlined_call_operand.hbm [shape: f32[8,16], index: 1, kind: input, shape index: {}]   ;;  %s1049_s2 = inlined_call_operand.vmem [shape: f32[4], index: 2, kind: input, shape index: {}]   ;;  %s1050_s3 = inlined_call_operand.hbm [shape: f32[2,1,128], index: 3, kind: output, shape index: {}]  }
   0x1   :  { %1051 = sst [smem:[#allocation14_spill]] %s1048_s1 }
   0x2   :  { %8 = vsyncpa [#allocation3], 0 }
   0x3   :  { %10 = vsyncpa [#allocation3 + $0x1], 0 }
   0x4   :  { %11 = vsyncpa [#allocation7], 0 }
   0x5   :  { %12 = vsyncpa [#allocation5], 0 }
   0x6   :  { %13 = vsyncpa [#allocation4], 0 }
   0x7   :  { %15 = vsyncpa [#allocation4 + $0x1], 0  ;;  %s888_s12 = smov 0   ;;  %s890_s13 = smov 0  }
   0x8   :  { %s892_s14 = smov 0   ;;  %s894_s15 = smov 0  }
   0x9   :  { %s896_s16 = smov 0   ;;  %s898_s17 = smov 0  }
   0xa LB: > { %s575_s18 = sadd.s32 4294967295, %s861_s17   ;;  %s576_s19 = sadd.s32 4294967294, %s861_s17   ;;  %s861_s17 = sphi %s898_s17, %s21_s17   ;;  %s857_s16 = sphi %s896_s16, %s1064_s16   ;;  %s853_s15 = sphi %s894_s15, %s1063_s15   ;;  %s849_s14 = sphi %s892_s14, %s1062_s14   ;;  %s845_s13 = sphi %s890_s13, %s1061_s13   ;;  %s841_s12 = sphi %s888_s12, %s1060_s12  }
   0xb   : > { %s42_s20 = sadd.s32 1, %s849_s14  ;;  %p49_p0 = scmp.ne.s32.totalorder %s849_s14, %s845_s13 }
   0xc   : > { %p50_p1 = scmp.eq.s32.totalorder %s861_s17, 0  ;;  %p55_p2 = scmp.ne.s32.totalorder %s845_s13, %s841_s12 }
   0xd   : > { %p926_p3 = scmp.eq.s32.totalorder %s575_s18, 0  ;;  %p123_p4 = scmp.eq.s32.totalorder %s575_s18, 1 }
   0xe   : > { %p930_p5 = por %p50_p1, %p49_p0  ;;  %p129_p6 = scmp.eq.s32.totalorder %s576_s19, 1 }
   0xf   : > { %p936_p7 = por %p926_p3, %p55_p2  ;;  %p940_p8 = por %p123_p4, %p49_p0 }
  0x10   : > { %p944_p9 = por %p129_p6, %p55_p2  ;;  %p577_p10 = scmp.ge.s32.totalorder %s861_s17, 1 }
  0x11   : > { %p136_p11 = scmp.lt.s32.totalorder %s861_s17, 3  ;;  %s1057_s1 = sld [smem:[#allocation14_spill]] }
  0x12   : > { %s863_s30 = smov [#allocation6]   ;;  %p580_p13 = scmp.ge.s32.totalorder %s861_s17, 2 }
  0x13   : > { %p953_p12 = pnand %p577_p10, %p136_p11  ;;  %s150_s4 = sshll.u32 %s863_s30, 4  ;;  %s151_s4 = int_to_ptr.vmem [resolvable:$true] %s150_s4 }
  0x14   : > { %p631_p1 = scmp.lt.s32.totalorder %s861_s17, 2  ;;  %s160_s7 = sshll.u32 %s1049_s2, 4  ;;  %s161_s7 = int_to_ptr.vmem [resolvable:$true] %s160_s7 }
  0x15   : > { %p614_p0 = pneg %p953_p12  ;;  %s864_s9 = smov [#allocation8]  }
  0x16   : > { %p968_p4 = pnand %p631_p1, %p930_p5  ;;  %s33_s10 = sadd.s32 1, %s857_s16 }
  0x17   : > { %s148_s28 = sshll.u32 %s1057_s1, 4  ;;  %p615_p2 = pnand %p614_p0, %p926_p3  ;;  %s149_s28 = int_to_ptr.hbm [resolvable:$true] %s148_s28 }
  0x18   : > { %s171_s11 = sand.u32 1, %s849_s14   ;;  %p35_p6 = scmp.ge.s32.totalorder %s33_s10, 2 }
  0x19   : > { %617 = dma.hbm_to_vmem [thread:$0]  (!%p615_p2), %s149_s28, 128, %s151_s4, [#allocation7]  }
  0x1a   : > { %620 = dma.vmem_to_smem (!%p615_p2), %s161_s7, 16, %s864_s9, [#allocation5]  }
  0x1b   : > { %s581_s18 = sshll.u32 %s171_s11, 6  ;;  %s601_s19 = sshll.u32 %s857_s16, 6 }
  0x1c   : > { %s1066_s10 = smov (%p35_p6, %s33_s10), 0  ;;  %s181_s22 = scalar_lea.hbm %s1047_s0, %s601_s19 }
  0x1d   : > { %s37_s30 = ssub.s32 %s857_s16, %s1066_s10  ;;  %s182_s5 = sshll.u32 %s181_s22, 4  ;;  %s183_s5 = int_to_ptr.hbm [resolvable:$true] %s182_s5 }
  0x1e   : > { %p40_p5 = scmp.eq.s32.totalorder %s37_s30, 0  ;;  %s175_s28 = scalar_lea.vmem [#allocation2], %s581_s18 }
  0x1f   : > { %s184_s4 = sshll.u32 %s175_s28, 4  ;;  %s172_s7 = scalar_lea.sflag [#allocation3], %s171_s11  ;;  %s185_s4 = int_to_ptr.vmem [resolvable:$true] %s184_s4 }
  0x20   : > { %s985_s6 = scalar_select %p40_p5, %s849_s14, %s42_s20  }
  0x21   : > { %s865_s9 = smov 128   ;;  %s866_s1 = smov 8  }
  0x22   : > { %624 = dma.hbm_to_vmem [thread:$0]  (!%p968_p4), %s183_s5, 1024, %s185_s4, %s172_s7, %s865_s9, %s865_s9, %s866_s1  }
  0x23   : > { %196 = sbr.rel (%p953_p12) target bundleno = 286 (0x11e), region = 32  ;;  %s992_s19 = sand.u32 (!%p953_p12), 1, %s845_s13  }
  0x24   : > { %s585_s18 = sshll.u32 (!%p953_p12), %s992_s19, 6  ;;  %s199_s26 = scalar_lea.sflag (!%p953_p12), [#allocation3], %s992_s19 }
  0x25   : > { %s202_s27 = scalar_lea.vmem (!%p953_p12), [#allocation2], %s585_s18 }
  0x28   : > { %824 = dma.done.wait (%p936_p7), %s199_s26, 1024  }
  0x29   : > { %826 = vsyncadd (%p936_p7), %s199_s26, 4294966272 }
  0x2a   : > { %828 = dma.done.wait (%p926_p3), [#allocation7], 128  }
  0x2b   : > { %830 = vsyncadd (%p926_p3), [#allocation7], 4294967168 }
  0x2c   : > { %832 = dma.done.wait (%p926_p3), [#allocation5], 16  }
  0x2d   : > { %834 = vsyncadd (%p926_p3), [#allocation5], 4294967280 }
  0x2e   : > { %218 = sfence }
  0x2f   : > { %s236_s1 = sld [smem:[#allocation8]]  ;;  %v237_v0 = vld [vmem:[%s202_s27] sm:$0xff]  ;;  %v238_v1 = vld [vmem:[%s202_s27 + $0x8] sm:$0xff]  ;;  %v589_v2 = vld [vmem:[%s202_s27 + $0x10] sm:$0xff]  ;;  %vm314_vm4 = vcmask 130048   ;;  %s472_s11 = scalar_lea.hbm %s1050_s3, %s853_s15 }
  0x30   : > { %s588_s20 = sld [smem:[#allocation8 + $0x1]]  ;;  %v590_v3 = vld [vmem:[%s202_s27 + $0x18] sm:$0xff]  ;;  %v592_v5 = vld [vmem:[%s202_s27 + $0x20] sm:$0xff]  ;;  %v593_v6 = vld [vmem:[%s202_s27 + $0x28] sm:$0xff]  ;;  %s235_s22 = scalar_lea.vmem [#allocation9], %s992_s19 }
  0x31   : > { %s591_s29 = sld [smem:[#allocation8 + $0x2]]  ;;  %v595_v10 = vld [vmem:[%s202_s27 + $0x30] sm:$0xff]  ;;  %v596_v11 = vld [vmem:[%s202_s27 + $0x38] sm:$0xff]  ;;  %v313_v60 = vld [vmem:[#allocation6] sm:$0xff]  ;;  %s474_s30 = sshll.u32 %s235_s22, 4  ;;  %s475_s30 = int_to_ptr.vmem [resolvable:$true] %s474_s30 }
  0x32   : > { %s594_s8 = sld [smem:[#allocation8 + $0x3]]  ;;  %s476_s5 = sshll.u32 %s472_s11, 4  ;;  %s477_s5 = int_to_ptr.hbm [resolvable:$true] %s476_s5 }
  0x33   : > { %s463_s28 = scalar_lea.sflag [#allocation4], %s992_s19  ;;  %s785_s4 = sshra.s32 %s477_s5, 4  ;;  %s786_s4 = int_to_ptr.hbm [resolvable:$true] %s785_s4 }
  0x34   : > { %s787_s7 = scalar_lea.hbm %s786_s4, 1  ;;  %s791_s18 = scalar_lea.hbm %s1050_s3, 2 }
  0x35   : > { %v239_v4 = vstv %s236_s1  ;;  %p788_p3 = scmp.ne.s32.totalorder %s786_s4, %s787_s7  ;;  %p792_p11 = scmp.lt.s32.totalorder %s786_s4, %s1050_s3 }
  0x36   : > { %v240_v7 = vmul.f32 %v239_v4, %v237_v0  ;;  %v241_v8 = vmul.f32 %v239_v4, %v238_v1  ;;  %v246_v9 = vstv %s588_s20  ;;  %p793_p12 = scmp.lt.s32.totalorder %s791_s18, %s787_s7 }
  0x37   : > { %v247_v12 = vmul.f32 %v589_v2, %v246_v9  ;;  %v248_v13 = vmul.f32 %v590_v3, %v246_v9  ;;  %v255_v14 = vstv %s591_s29  ;;  %p789_p7 = pnand %p788_p3, %p940_p8 }
  0x38   : > { %v256_v15 = vmul.f32 %v592_v5, %v255_v14  ;;  %v257_v16 = vmul.f32 %v593_v6, %v255_v14  ;;  %v264_v17 = vstv %s594_s8  ;;  %p794_p0 = por %p793_p12, %p792_p11 }
  0x39   : > { %v249_v18 = vadd.f32 %v247_v12, %v240_v7  ;;  %v250_v19 = vadd.f32 %v248_v13, %v241_v8  ;;  %v265_v20 = vmul.f32 %v595_v10, %v264_v17  ;;  %v266_v21 = vmul.f32 %v596_v11, %v264_v17  ;;  %p790_p10 = pneg %p789_p7 }
  0x3b   : > { %v258_v22 = vadd.f32 %v256_v15, %v249_v18  ;;  %v259_v23 = vadd.f32 %v257_v16, %v250_v19  ;;  %p795_p1 = pnand %p794_p0, %p790_p10 }
  0x3d   : > { %v267_v24 = vadd.f32 %v265_v20, %v258_v22  ;;  %v268_v25 = vadd.f32 %v266_v21, %v259_v23 }
  0x3f   : > { %v269_v26 = vmin.f32 %v267_v24, %v268_v25  ;;  %v276_v27 = vmax.f32 %v267_v24, %v268_v25 }
  0x41   : > { %v270_v28 = vrot.slane %v269_v26, 4  ;;  %v277_v29 = vrot.slane %v276_v27, 4 }
  0x43   : > { %v271_v30 = vmin.f32 %v269_v26, %v270_v28  ;;  %v278_v31 = vmax.f32 %v276_v27, %v277_v29 }
  0x45   : > { %v272_v32 = vrot.slane %v271_v30, 2  ;;  %v279_v33 = vrot.slane %v278_v31, 2 }
  0x47   : > { %v273_v34 = vmin.f32 %v271_v30, %v272_v32  ;;  %v280_v35 = vmax.f32 %v278_v31, %v279_v33 }
  0x49   : > { %v274_v36 = vrot.slane %v273_v34, 1  ;;  %v281_v37 = vrot.slane %v280_v35, 1 }
  0x4b   : > { %v275_v38 = vmin.f32 %v273_v34, %v274_v36  ;;  %v282_v39 = vmax.f32 %v280_v35, %v281_v37 }
  0x4d   : > { %v283_v40 = vsub.f32 %v282_v39, %v275_v38  ;;  %v286_v49 = vsub.f32 %v268_v25, %v275_v38  ;;  %v285_v51 = vsub.f32 %v267_v24, %v275_v38 }
  0x4f   : > { %v284_v41 = vmax.f32 %v283_v40, 1e-12 }
  0x51   : > { %688 = vrcp.f32 %v284_v41  ;;  %v298_v44 = vand.u32 2147483648, %v284_v41  ;;  %vm292_vm0 = vweird.f32 %v284_v41  ;;  %v296_v46 = vand.u32 2147483647, %v284_v41 }
  0x53   : > { %v299_v48 = vor.u32 1.1754944e-38, %v298_v44  ;;  %vm297_vm3 = vcmp.eq.f32.partialorder %v296_v46, 8.507059e+37  ;;  %v867_v44 = vmov -1e-12  }
  0x57   : > { %v689_v42 = vpop.eup %688 }
  0x58   : > { %v288_v43 = vmul.f32 %v689_v42, %v284_v41  ;;  %vm293_vm1 = vweird.f32 %v689_v42 }
  0x59   : > { %vm294_vm2 = vmor %vm292_vm0, %vm293_vm1 }
  0x5a   : > { %v289_v45 = vsub.f32 1.0, %v288_v43 }
  0x5c   : > { %v290_v47 = vmul.f32 %v689_v42, %v289_v45 }
  0x5e   : > { %v291_v50 = vadd.f32 %v689_v42, %v290_v47 }
  0x60   : > { %v295_v52 = vsel %vm294_vm2, %v689_v42, %v291_v50 }
  0x61   : > { %v300_v53 = vsel %vm297_vm3, %v299_v48, %v295_v52 }
  0x62   : > { %v302_v54 = vmul.f32 %v300_v53, %v286_v49  ;;  %v301_v55 = vmul.f32 %v300_v53, %v285_v51 }
  0x64   : > { %v304_v56 = vadd.f32 0.001, %v302_v54  ;;  %v303_v57 = vadd.f32 0.001, %v301_v55 }
  0x66   : > { %v310_v58 = vmul.f32 %v304_v56, %v304_v56  ;;  %v309_v59 = vmul.f32 %v303_v57, %v303_v57  ;;  %690 = vlog2.f32 %v304_v56 }
  0x67   : > { %692 = vlog2.f32 %v303_v57 }
  0x68   : > { %332 = vmatpush.msra.mxu0 %v310_v58 }
  0x6a   : > { %333 = vmatpush.msra.mxu0 %v309_v59 }
  0x6b   : > { %597 = vmatmul.msk.f32.vlgmr.msra.gmra.mxu0 %vm314_vm4, %v313_v60 }
  0x6c   : > { %v691_v61 = vpop.eup %690 }
  0x6d   : > { %v693_v62 = vpop.eup %692  ;;  %v308_v63 = vmul.f32 0.6931472, %v691_v61 }
  0x6e   : > { %v306_v0 = vmul.f32 0.6931472, %v693_v62 }
  0x6f   : > { %v312_v1 = vmul.f32 %v310_v58, %v308_v63 }
  0x70   : > { %v311_v2 = vmul.f32 %v309_v59, %v306_v0 }
  0x71   : > { %352 = vmatpush.msra.mxu1 %v312_v1 }
  0x73   : > { %353 = vmatpush.msra.mxu1 %v311_v2 }
  0x74   : > { %598 = vmatmul.msk.f32.vlgmr.msra.gmra.mxu1 %vm314_vm4, %v313_v60 }
  0xe8   : > { %v335_v3 = vpop.f32.mrf.mxu0 }
  0xe9   : > { %v401_v5 = vrot.slane %v335_v3, 7  ;;  %v421_v6 = vrot.slane %v335_v3, 2  ;;  %v414_v11 = vrot.slane %v335_v3, 6  ;;  %v374_v12 = vrot.slane %v335_v3, 3 }
  0xea   : > { %v389_v15 = vrot.slane %v335_v3, 1  ;;  %v364_v19 = vrot.slane %v335_v3, 4  ;;  %v358_v37 = vmul.f32 %v335_v3, %v335_v3 }
  0xeb   : > { %v376_v21 = vmul.f32 %v374_v12, %v335_v3 }
  0xec   : > { %v366_v28 = vmul.f32 %v364_v19, %v335_v3  ;;  %v391_v52 = vmul.f32 %v389_v15, %v335_v3 }
  0xf1   : > { %v355_v4 = vpop.f32.mrf.mxu1 }
  0xf2   : > { %v411_v7 = vrot.slane %v355_v4, 5  ;;  %v382_v8 = vrot.slane %v355_v4, 2  ;;  %v405_v9 = vmul.f32 %v355_v4, %v335_v3  ;;  %v403_v13 = vmul.f32 %v401_v5, %v355_v4 }
  0xf3   : > { %v423_v14 = vmul.f32 %v421_v6, %v355_v4  ;;  %v367_v20 = vrot.slane %v355_v4, 1  ;;  %v360_v38 = vrot.slane %v355_v4, 7  ;;  %v392_v53 = vrot.slane %v355_v4, 6 }
  0xf4   : > { %v413_v10 = vmul.f32 %v411_v7, %v335_v3  ;;  %v429_v17 = vmul.f32 %v382_v8, %v335_v3  ;;  %v406_v18 = vmul.f32 %v405_v9, %v389_v15  ;;  %v404_v22 = vmul.f32 %v403_v13, %v401_v5 }
  0xf5   : > { %v424_v24 = vmul.f32 %v423_v14, %v421_v6  ;;  %v435_v31 = vmul.f32 %v376_v21, %v367_v20  ;;  %v369_v34 = vmul.f32 %v367_v20, %v366_v28  ;;  %v362_v42 = vmul.f32 %v360_v38, %v358_v37 }
  0xf6   : > { %v416_v16 = vmul.f32 %v414_v11, %v413_v10  ;;  %v408_v25 = vrot.slane %v406_v18, 7  ;;  %v430_v26 = vmul.f32 %v429_v17, %v421_v6  ;;  %v377_v43 = vmul.f32 %v376_v21, %v360_v38 }
  0xf7   : > { %v426_v29 = vrot.slane %v424_v24, 6  ;;  %v437_v36 = vrot.slane %v435_v31, 6  ;;  %v371_v40 = vrot.slane %v369_v34, 6  ;;  %v384_v49 = vmul.f32 %v382_v8, %v376_v21 }
  0xf8   : > { %v418_v23 = vrot.slane %v416_v16, 1  ;;  %v410_v27 = vsub.f32 %v404_v22, %v408_v25  ;;  %v432_v32 = vrot.slane %v430_v26, 6  ;;  %v379_v48 = vrot.slane %v377_v43, 7 }
  0xf9   : > { %v373_v46 = vsub.f32 %v362_v42, %v371_v40  ;;  %v386_v51 = vrot.slane %v384_v49, 6  ;;  %v394_v57 = vmul.f32 %v392_v53, %v391_v52  ;;  %v396_v58 = vmul.f32 %v391_v52, %v367_v20 }
  0xfa   : > { %v420_v30 = vsub.f32 %v410_v27, %v418_v23 }
  0xfb   : > { %v381_v50 = vadd.f32 %v379_v48, %v373_v46  ;;  %v398_v0 = vrot.slane %v396_v58, 7 }
  0xfc   : > { %v428_v33 = vadd.f32 %v426_v29, %v420_v30 }
  0xfd   : > { %v388_v55 = vadd.f32 %v386_v51, %v381_v50 }
  0xfe   : > { %v434_v35 = vsub.f32 %v428_v33, %v432_v32 }
  0xff   : > { %v395_v61 = vsub.f32 %v388_v55, %v394_v57 }
 0x100   : > { %v439_v39 = vadd.f32 %v437_v36, %v434_v35 }
 0x101   : > { %v400_v3 = vsub.f32 %v395_v61, %v398_v0 }
 0x102   : > { %v440_v41 = vand.u32 2147483647, %v439_v39  ;;  %vm442_vm5 = vcmp.ge.f32.partialorder %v439_v39, 0.0 }
 0x103   : > { %v443_v45 = vsel %vm442_vm5, 1e-12, %v867_v44 }
 0x104   : > { %vm441_vm6 = vcmp.lt.f32.partialorder %v440_v41, 1e-12 }
 0x105   : > { %v444_v47 = vsel %vm441_vm6, %v443_v45, %v439_v39 }
 0x106   : > { %694 = vrcp.f32 %v444_v47  ;;  %v456_v60 = vand.u32 2147483648, %v444_v47  ;;  %v454_v63 = vand.u32 2147483647, %v444_v47  ;;  %vm450_vm8 = vweird.f32 %v444_v47 }
 0x108   : > { %v457_v2 = vor.u32 1.1754944e-38, %v456_v60  ;;  %vm455_vm10 = vcmp.eq.f32.partialorder %v454_v63, 8.507059e+37 }
 0x10c   : > { %v695_v54 = vpop.eup %694 }
 0x10d   : > { %v446_v56 = vmul.f32 %v695_v54, %v444_v47  ;;  %vm451_vm7 = vweird.f32 %v695_v54 }
 0x10e   : > { %vm452_vm9 = vmor %vm450_vm8, %vm451_vm7 }
 0x10f   : > { %v447_v59 = vsub.f32 1.0, %v446_v56 }
 0x111   : > { %v448_v62 = vmul.f32 %v695_v54, %v447_v59 }
 0x113   : > { %v449_v1 = vadd.f32 %v695_v54, %v448_v62 }
 0x115   : > { %v453_v4 = vsel %vm452_vm9, %v695_v54, %v449_v1 }
 0x116   : > { %v458_v5 = vsel %vm455_vm10, %v457_v2, %v453_v4 }
 0x117   : > { %v459_v6 = vmul.f32 %v458_v5, %v400_v3 }
 0x119   : > { %v460_v7 = vmul.f32 -7.5, %v459_v6 }
 0x11b   : > { %461 = vst [vmem:[%s235_s22 - $0x2] sm:$0x4] %v460_v7 }
 0x11c   : > { %798 = shalt.err (!%p795_p1)
}
 0x11d   : > { %612 = dma.vmem_to_hbm [thread:$0]  (%p940_p8), %s475_s30, 16, %s477_s5, %s463_s28  }
 0x11e PF: > { %s488_s19 = sand.u32 1, %s841_s12   ;;  %p626_p2 = pnand %p580_p13, %p944_p9 }
 0x11f   : > { %s489_s1 = scalar_lea.sflag [#allocation4], %s488_s19 }
 0x120   : > { %p627_p4 = pneg %p626_p2 }
 0x122   : > { %836 = dma.done.wait (%p627_p4), %s489_s1, 16  }
 0x123   : > { %838 = vsyncadd (%p627_p4), %s489_s1, 4294967280  ;;  %s21_s17 = sadd.s32 1, %s861_s17   ;;  %s1060_s12 = smov %s845_s13 }
 0x124   : > { %p18_p6 = scmp.ge.s32.totalorder %s21_s17, 4   ;;  %s1061_s13 = smov %s849_s14 }
 0x125   : > { %s1062_s14 = smov %s985_s6  ;;  %s1063_s15 = smov %s857_s16 }
 0x126   : > { %s1064_s16 = smov %s1066_s10  ;;  %20 = sbr.rel (!%p18_p6) target bundleno = 10 (0xa), region = 89 }
 0x12b   :  { %494 = vsyncpa [#allocation3], 1 }
 0x12c   :  { %496 = vsyncpa [#allocation3 + $0x1], 1 }
 0x12d   :  { %497 = vsyncpa [#allocation7], 1 }
 0x12e   :  { %498 = vsyncpa [#allocation4], 1 }
 0x12f   :  { %500 = vsyncpa [#allocation4 + $0x1], 1 }
 0x130   :  { %501 = vsyncpa [#allocation5], 1 }
 0x131   :  { %503 = vsyncpa [#allocation5 + $0x1], 1 }

</bundles_post_ra>
